<compile_context>
chip_gen: v5e
topology: v5e:2x2
jax: 0.10.0
libtpu: 0.0.40
codegen_flags: <defaults>
</compile_context>

<pallas_src>
import jax
import jax.numpy as jnp
from jax.experimental import pallas as pl
from jax.experimental.pallas import tpu as pltpu


def _round_up(x, m):
    return ((x + m - 1) // m) * m


def _fusion_kernel(img_ref, bbox_ref, wp_ref, bp_ref, wa_img_ref, wa_bbox_ref,
                   ba_ref, out_ref):
    img = img_ref[...].astype(jnp.float32)        # (TB, img_dim)
    bbox = bbox_ref[...].astype(jnp.float32)      # (TB, bbox_dim)

    # bbox projection on the MXU: (TB, bbox_dim) @ (bbox_dim, proj_dim)
    proj = jnp.dot(bbox, wp_ref[...], preferred_element_type=jnp.float32)
    proj = proj + bp_ref[...]                     # bias row (1, proj_dim) broadcasts

    # Attention logit: weight was folded through the projection on the host, so
    # this is independent of `proj` and runs on the VPU (mul) + XLU (lane reduce).
    score = (jnp.sum(img * wa_img_ref[...], axis=-1, keepdims=True)
             + jnp.sum(bbox * wa_bbox_ref[...], axis=-1, keepdims=True)
             + ba_ref[0, 0])                      # scalar bias from SMEM -> (TB, 1)
    s = jax.nn.sigmoid(score)

    # Gated mix: proj + s*(img - proj)  ==  s*img + (1-s)*proj
    out_ref[...] = (proj + s * (img - proj)).astype(out_ref.dtype)


def attention_fusion(img_features, bbox_features, w_proj, b_proj, w_attn, b_attn,
                     *, vmem_budget_bytes=32 * 1024 * 1024, max_batch_tile=32768):
    """Pallas implementation of AttentionFusion.forward.

    img_features:  (B, img_dim)
    bbox_features: (B, bbox_dim)
    w_proj:        (bbox_dim, proj_dim)   (already transposed vs. torch Linear.weight)
    b_proj:        (proj_dim,)
    w_attn:        (img_dim + proj_dim, 1)
    b_attn:        scalar ()
    """
    B, img_dim = img_features.shape
    bbox_dim = bbox_features.shape[1]
    proj_dim = w_proj.shape[1]
    assert img_dim == proj_dim, "AttentionFusion requires img_dim == proj_dim"

    out_dtype = img_features.dtype
    if B == 0:
        return jnp.zeros((0, img_dim), out_dtype)

    img_isz = jnp.dtype(img_features.dtype).itemsize
    bbox_isz = jnp.dtype(bbox_features.dtype).itemsize
    out_isz = jnp.dtype(out_dtype).itemsize

    # ---- batch tile from a VMEM budget (double-buffered img-in, bbox-in, out) ----
    row_bytes = 2 * (img_dim * img_isz + bbox_dim * bbox_isz + img_dim * out_isz)
    tile = max(128, (vmem_budget_bytes // row_bytes) // 128 * 128)
    tile = min(tile, max_batch_tile)
    # >= 2 grid steps for large B so both v7x TensorCores get work.
    tile = min(tile, _round_up(pl.cdiv(B, 2), 128))
    # Never larger than the (sublane-rounded) batch; keep sublane divisibility.
    tile = min(tile, _round_up(B, 8))
    tile = max(tile, 8)

    grid = (pl.cdiv(B, tile),)   # ragged last block handled by Pallas

    # ---- tiny host-side parameter prep (no large HBM passes) ----
    wp_f32 = w_proj.astype(jnp.float32)                                  # (bbox_dim, proj_dim)
    bp_row = b_proj.astype(jnp.float32).reshape(1, proj_dim)
    wa_img = w_attn[:img_dim, 0].astype(jnp.float32).reshape(1, img_dim)
    wa_proj = w_attn[img_dim:, 0].astype(jnp.float32)                    # (proj_dim,)
    # Fold attention weight through the projection: proj@wa_proj == bbox@(W_proj@wa_proj)+b_proj@wa_proj
    wa_bbox = jnp.dot(wp_f32, wa_proj).reshape(1, bbox_dim)
    ba_eff = (jnp.asarray(b_attn, jnp.float32)
              + jnp.dot(b_proj.astype(jnp.float32), wa_proj)).reshape(1, 1)

    # ---- cost estimate (real HBM traffic / flops) ----
    flops = (2 * B * bbox_dim * proj_dim          # projection matmul
             + 2 * B * (img_dim + bbox_dim)       # attention logit dots
             + 4 * B * img_dim)                   # gated mix
    bytes_accessed = (B * img_dim * img_isz + B * bbox_dim * bbox_isz
                      + B * img_dim * out_isz
                      + 4 * (bbox_dim * proj_dim + proj_dim + img_dim + bbox_dim + 1))
    cost = pl.CostEstimate(flops=flops, transcendentals=B,
                           bytes_accessed=bytes_accessed)

    return pl.pallas_call(
        _fusion_kernel,
        out_shape=jax.ShapeDtypeStruct((B, img_dim), out_dtype),
        grid_spec=pltpu.PrefetchScalarGridSpec(
            num_scalar_prefetch=0,
            grid=grid,
            in_specs=[
                pl.BlockSpec((tile, img_dim), lambda i: (i, 0)),       # img tile
                pl.BlockSpec((tile, bbox_dim), lambda i: (i, 0)),      # bbox tile
                pl.BlockSpec((bbox_dim, proj_dim), lambda i: (0, 0)),  # W_proj (resident)
                pl.BlockSpec((1, proj_dim), lambda i: (0, 0)),         # b_proj row
                pl.BlockSpec((1, img_dim), lambda i: (0, 0)),          # wa_img row
                pl.BlockSpec((1, bbox_dim), lambda i: (0, 0)),         # wa_bbox row (folded)
                pl.BlockSpec(memory_space=pltpu.MemorySpace.SMEM),     # effective attn bias
            ],
            out_specs=pl.BlockSpec((tile, img_dim), lambda i: (i, 0)),
        ),
        compiler_params=pltpu.CompilerParams(
            dimension_semantics=("parallel",),      # batch tiles shard across TCs
            vmem_limit_bytes=48 * 1024 * 1024,      # headroom over 32 MiB budget; < v7x 64 MiB
        ),
        cost_estimate=cost,
    )(img_features, bbox_features, wp_f32, bp_row, wa_img, wa_bbox, ba_eff)


def _reference(img, bbox, w_proj, b_proj, w_attn, b_attn):
    proj = bbox @ w_proj + b_proj
    comb = jnp.concatenate([img, proj], axis=1)
    s = jax.nn.sigmoid(comb @ w_attn + b_attn)
    return s * img + (1.0 - s) * proj


def _make_inputs(key, B, img_dim, bbox_dim, proj_dim):
    k_img, k_bbox, k_wp, k_bp, k_wa, k_ba = jax.random.split(key, 6)
    img_features = jax.random.normal(k_img, (B, img_dim), jnp.float32)
    bbox_features = jax.random.normal(k_bbox, (B, bbox_dim), jnp.float32)
    bound_p = 1.0 / jnp.sqrt(bbox_dim)
    w_proj = jax.random.uniform(k_wp, (bbox_dim, proj_dim), jnp.float32,
                                -bound_p, bound_p)
    b_proj = jax.random.uniform(k_bp, (proj_dim,), jnp.float32, -bound_p, bound_p)
    bound_a = 1.0 / jnp.sqrt(img_dim + proj_dim)
    w_attn = jax.random.uniform(k_wa, (img_dim + proj_dim, 1), jnp.float32,
                                -bound_a, bound_a)
    b_attn = jax.random.uniform(k_ba, (), jnp.float32, -bound_a, bound_a)
    return img_features, bbox_features, w_proj, b_proj, w_attn, b_attn


if __name__ == "__main__":
    img_dim, bbox_dim, proj_dim = 32, 8, 32
    key = jax.random.PRNGKey(0)
    k1, k2 = jax.random.split(key)

    # Small batch (single grid step).
    args = _make_inputs(k1, 16, img_dim, bbox_dim, proj_dim)
    out = jax.block_until_ready(attention_fusion(*args))
    ref = _reference(*args)
    assert out.shape == (16, img_dim)
    assert jnp.allclose(out, ref, atol=1e-4, rtol=1e-4), "mismatch vs reference (B=16)"

    # Batch that exercises the ragged last block + multi-step grid.
    args2 = _make_inputs(k2, 300, img_dim, bbox_dim, proj_dim)
    out2 = jax.block_until_ready(attention_fusion(*args2))
    ref2 = _reference(*args2)
    assert out2.shape == (300, img_dim)
    assert jnp.allclose(out2, ref2, atol=1e-4, rtol=1e-4), "mismatch vs reference (B=300)"

    print("KERNEL_OK")
</pallas_src>

<mosaic_0001>
module attributes {stable_mosaic.version = 11 : i64} {
  func.func @_fusion_kernel(%arg0: i32, %arg1: memref<16x32xf32, #tpu.memory_space<vmem>>, %arg2: memref<16x8xf32, #tpu.memory_space<vmem>>, %arg3: memref<8x32xf32, #tpu.memory_space<vmem>>, %arg4: memref<1x32xf32, #tpu.memory_space<vmem>>, %arg5: memref<1x32xf32, #tpu.memory_space<vmem>>, %arg6: memref<1x8xf32, #tpu.memory_space<vmem>>, %arg7: memref<1x1xf32, #tpu.memory_space<smem>>, %arg8: memref<16x32xf32, #tpu.memory_space<vmem>>) attributes {dimension_semantics = [#tpu.dimension_semantics<parallel>], iteration_bounds = array<i64: 1>, scalar_prefetch = 0 : i64, scratch_operands = 0 : i64, tpu.core_type = #tpu.core_type<tc>, window_params = [{transform_indices = @transform_0, window_bounds = array<i64: 16, 32>}, {transform_indices = @transform_1, window_bounds = array<i64: 16, 8>}, {pipeline_mode = #tpu.pipeline_mode<synchronous>, transform_indices = @transform_2, window_bounds = array<i64: 8, 32>}, {pipeline_mode = #tpu.pipeline_mode<synchronous>, transform_indices = @transform_3, window_bounds = array<i64: 1, 32>}, {pipeline_mode = #tpu.pipeline_mode<synchronous>, transform_indices = @transform_4, window_bounds = array<i64: 1, 32>}, {pipeline_mode = #tpu.pipeline_mode<synchronous>, transform_indices = @transform_5, window_bounds = array<i64: 1, 8>}, {transform_indices = @transform_6, window_bounds = array<i64: 1, 1>}, {transform_indices = @transform_7, window_bounds = array<i64: 16, 32>}]} {
    %c0 = arith.constant 0 : index
    %c0_0 = arith.constant 0 : index
    %0 = vector.load %arg1[%c0, %c0_0] : memref<16x32xf32, #tpu.memory_space<vmem>>, vector<16x32xf32>
    %c0_1 = arith.constant 0 : index
    %c0_2 = arith.constant 0 : index
    %1 = vector.load %arg2[%c0_1, %c0_2] : memref<16x8xf32, #tpu.memory_space<vmem>>, vector<16x8xf32>
    %c0_3 = arith.constant 0 : index
    %c0_4 = arith.constant 0 : index
    %2 = vector.load %arg3[%c0_3, %c0_4] : memref<8x32xf32, #tpu.memory_space<vmem>>, vector<8x32xf32>
    %cst = arith.constant dense<0.000000e+00> : vector<16x32xf32>
    %3 = tpu.matmul %1, %2, %cst {dimension_numbers = #tpu.dot_dimension_numbers<[1], [0], [0], [1], [0, 0, 1, 1], [], []>} : vector<16x8xf32>, vector<8x32xf32>, vector<16x32xf32> -> vector<16x32xf32>
    %c0_5 = arith.constant 0 : index
    %c0_6 = arith.constant 0 : index
    %4 = vector.load %arg4[%c0_5, %c0_6] : memref<1x32xf32, #tpu.memory_space<vmem>>, vector<1x32xf32>
    %5 = vector.broadcast %4 : vector<1x32xf32> to vector<16x32xf32>
    %6 = arith.addf %3, %5 : vector<16x32xf32>
    %c0_7 = arith.constant 0 : index
    %c0_8 = arith.constant 0 : index
    %7 = vector.load %arg5[%c0_7, %c0_8] : memref<1x32xf32, #tpu.memory_space<vmem>>, vector<1x32xf32>
    %8 = vector.broadcast %7 : vector<1x32xf32> to vector<16x32xf32>
    %9 = arith.mulf %0, %8 : vector<16x32xf32>
    %cst_9 = arith.constant dense<0.000000e+00> : vector<16xf32>
    %10 = vector.multi_reduction <add>, %9, %cst_9 [1] : vector<16x32xf32> to vector<16xf32>
    %11 = vector.shape_cast %10 : vector<16xf32> to vector<16x1xf32>
    %c0_10 = arith.constant 0 : index
    %c0_11 = arith.constant 0 : index
    %12 = vector.load %arg6[%c0_10, %c0_11] : memref<1x8xf32, #tpu.memory_space<vmem>>, vector<1x8xf32>
    %13 = vector.broadcast %12 : vector<1x8xf32> to vector<16x8xf32>
    %14 = arith.mulf %1, %13 : vector<16x8xf32>
    %cst_12 = arith.constant dense<0.000000e+00> : vector<16xf32>
    %15 = vector.multi_reduction <add>, %14, %cst_12 [1] : vector<16x8xf32> to vector<16xf32>
    %16 = vector.shape_cast %15 : vector<16xf32> to vector<16x1xf32>
    %17 = arith.addf %11, %16 : vector<16x1xf32>
    %c0_13 = arith.constant 0 : index
    %c0_14 = arith.constant 0 : index
    %18 = memref.load %arg7[%c0_13, %c0_14] : memref<1x1xf32, #tpu.memory_space<smem>>
    %19 = vector.broadcast %18 : f32 to vector<16x1xf32>
    %20 = arith.addf %17, %19 : vector<16x1xf32>
    %21 = arith.negf %20 : vector<16x1xf32>
    %22 = math.exp %21 : vector<16x1xf32>
    %cst_15 = arith.constant 1.000000e+00 : f32
    %23 = vector.broadcast %cst_15 : f32 to vector<16x1xf32>
    %24 = arith.addf %23, %22 : vector<16x1xf32>
    %25 = arith.divf %23, %24 : vector<16x1xf32>
    %26 = arith.subf %0, %6 : vector<16x32xf32>
    %27 = vector.broadcast %25 : vector<16x1xf32> to vector<16x32xf32>
    %28 = arith.mulf %27, %26 : vector<16x32xf32>
    %29 = arith.addf %6, %28 : vector<16x32xf32>
    %c0_16 = arith.constant 0 : index
    %c0_17 = arith.constant 0 : index
    %30 = vector.load %arg8[%c0_16, %c0_17] : memref<16x32xf32, #tpu.memory_space<vmem>>, vector<16x32xf32>
    tpu.vector_store %arg8[%c0_16, %c0_17], %29 {strides = array<i32>} : memref<16x32xf32, #tpu.memory_space<vmem>>, vector<16x32xf32>,
    return
  }
  func.func @transform_0(%arg0: i32) -> (i32, i32) {
    %c0_i32 = arith.constant 0 : i32
    %c0_i32_0 = arith.constant 0 : i32
    return %arg0, %c0_i32 : i32, i32
  }
  func.func @transform_1(%arg0: i32) -> (i32, i32) {
    %c0_i32 = arith.constant 0 : i32
    %c0_i32_0 = arith.constant 0 : i32
    return %arg0, %c0_i32 : i32, i32
  }
  func.func @transform_2(%arg0: i32) -> (i32, i32) {
    %c0_i32 = arith.constant 0 : i32
    %c0_i32_0 = arith.constant 0 : i32
    %c0_i32_1 = arith.constant 0 : i32
    return %c0_i32, %c0_i32_0 : i32, i32
  }
  func.func @transform_3(%arg0: i32) -> (i32, i32) {
    %c0_i32 = arith.constant 0 : i32
    %c0_i32_0 = arith.constant 0 : i32
    %c0_i32_1 = arith.constant 0 : i32
    return %c0_i32, %c0_i32_0 : i32, i32
  }
  func.func @transform_4(%arg0: i32) -> (i32, i32) {
    %c0_i32 = arith.constant 0 : i32
    %c0_i32_0 = arith.constant 0 : i32
    %c0_i32_1 = arith.constant 0 : i32
    return %c0_i32, %c0_i32_0 : i32, i32
  }
  func.func @transform_5(%arg0: i32) -> (i32, i32) {
    %c0_i32 = arith.constant 0 : i32
    %c0_i32_0 = arith.constant 0 : i32
    %c0_i32_1 = arith.constant 0 : i32
    return %c0_i32, %c0_i32_0 : i32, i32
  }
  func.func @transform_6(%arg0: i32) -> (i32, i32) {
    %c0_i32 = arith.constant 0 : i32
    %c0_i32_0 = arith.constant 0 : i32
    %c0_i32_1 = arith.constant 0 : i32
    return %c0_i32, %c0_i32_0 : i32, i32
  }
  func.func @transform_7(%arg0: i32) -> (i32, i32) {
    %c0_i32 = arith.constant 0 : i32
    %c0_i32_0 = arith.constant 0 : i32
    return %arg0, %c0_i32 : i32, i32
  }
}

</mosaic_0001>

<bundles_post_ra>
// kernel: tpu_custom_call.1
= control target key start
LH: loop header
LB: loop body
LE: loop exit
PB: predicated region body
PF: predicated region fallthrough
CT: control target
= control target key end

     0   :  { %vm37_vm0 = vcmask 64512   ;;  %vm73_vm1 = vcmask 261120   ;;  %s296_s0 = inlined_call_operand.vmem [shape: f32[16,32], index: 0, kind: input, shape index: {}]   ;;  %s297_s1 = inlined_call_operand.vmem [shape: f32[16,8], index: 1, kind: input, shape index: {}]   ;;  %s298_s2 = inlined_call_operand.vmem [shape: f32[8,32], index: 2, kind: input, shape index: {}]   ;;  %s299_s3 = inlined_call_operand.vmem [shape: f32[1,32], index: 3, kind: input, shape index: {}]   ;;  %s300_s4 = inlined_call_operand.vmem [shape: f32[1,32], index: 4, kind: input, shape index: {}]   ;;  %s301_s5 = inlined_call_operand.vmem [shape: f32[1,8], index: 5, kind: input, shape index: {}]   ;;  %s302_s6 = inlined_call_operand.<no memory space> [shape: f32[1,1], index: 6, kind: input, shape index: {}]   ;;  %s303_s7 = inlined_call_operand.hbm [shape: f32[16,32], index: 7, kind: output, shape index: {}]  }
   0x1   :  { %v30_v0 = vld [vmem:[%s297_s1] sm:$0xff]  ;;  %v31_v7 = vld [vmem:[%s297_s1 + $0x8] sm:$0xff] }
   0x2   :  { %v170_v1 = vld [vmem:[%s301_s5] ss:$0 sm:$0xff] }
   0x3   :  { %v259_v2 = vld [vmem:[%s296_s0] sm:$0xff]  ;;  %v84_v4 = vmul.f32 %v170_v1, %v30_v0 }
   0x4   :  { %v171_v3 = vld [vmem:[%s300_s4] ss:$0 sm:$0xff] }
   0x5   :  { %v32_v5 = vld [vmem:[%s298_s2] sm:$0xff]  ;;  %v71_v6 = vmul.f32 %v171_v3, %v259_v2 }
   0x6   :  { %59 = vmatpush.msra.mxu0 %v32_v5  ;;  %166 = vmatpush.msra.mxu1 %v32_v5 }
   0x7   :  { %13 = vsyncpa [#allocation4], 0  ;;  %v86_v8 = vsel %vm37_vm0, %v84_v4, 0.0  ;;  %v275_v9 = vld [vmem:[%s296_s0 + $0x8] sm:$0xff]  ;;  %162 = vmatmul.msk.f32.vlgmr.msra.gmra.mxu0 %vm37_vm0, %v30_v0  ;;  %163 = vmatmul.msk.f32.vlgmr.msra.gmra.mxu1 %vm37_vm0, %v31_v7  ;;  %v74_v10 = vsel %vm73_vm1, %v71_v6, 0.0  ;;  %v85_v11 = vmul.f32 %v170_v1, %v31_v7  ;;  %v95_v16 = vstv %s302_s6  ;;  %s150_s16 = sshll.u32 %s303_s7, 4  ;;  %s151_s16 = int_to_ptr.hbm [resolvable:$true] %s150_s16 }
   0x8   :  { %87 = vadd.xlane.f32.xlu1 %v86_v8  ;;  %75 = vadd.xlane.f32.xlu0 %v74_v10  ;;  %v72_v12 = vmul.f32 %v171_v3, %v275_v9  ;;  %v172_v29 = vld [vmem:[%s299_s3] ss:$0 sm:$0xff]  ;;  %s207_s3 = smov [#allocation3]   ;;  %s208_s17 = smov 128  }
   0x9   :  { %v89_v13 = vsel %vm37_vm0, %v85_v11, 0.0  ;;  %s148_s6 = sshll.u32 %s207_s3, 4  ;;  %s209_s18 = smov 8   ;;  %s149_s6 = int_to_ptr.vmem [resolvable:$true] %s148_s6 }
   0xa   :  { %v77_v14 = vsel %vm73_vm1, %v72_v12, 0.0 }
  0x10   :  { %90 = vadd.xlane.f32.xlu1 %v89_v13  ;;  %78 = vadd.xlane.f32.xlu0 %v77_v14 }
  0x7b   :  { %v88_v15 = vpop.xlane.xlu1 %87  ;;  %v76_v17 = vpop.xlane.xlu0 %75 }
  0x7c   :  { %v92_v18 = vadd.f32 %v88_v15, %v76_v17 }
  0x7e   :  { %v96_v19 = vadd.f32 %v95_v16, %v92_v18 }
  0x80   :  { %v164_v20 = vmul.f32 -1.442695, %v96_v19 }
  0x82   :  { %173 = vpow2.f32 %v164_v20 }
  0x83   :  { %v91_v21 = vpop.xlane.xlu1 %90  ;;  %v79_v22 = vpop.xlane.xlu0 %78 }
  0x84   :  { %v93_v23 = vadd.f32 %v91_v21, %v79_v22  ;;  %v61_v32 = vpop.f32.mrf.mxu0  ;;  %v64_v43 = vpop.f32.mrf.mxu1 }
  0x85   :  { %v62_v34 = vadd.f32 %v172_v29, %v61_v32  ;;  %v65_v48 = vadd.f32 %v172_v29, %v64_v43 }
  0x86   :  { %v97_v24 = vadd.f32 %v95_v16, %v93_v23 }
  0x87   :  { %v136_v40 = vsub.f32 %v259_v2, %v62_v34  ;;  %v137_v55 = vsub.f32 %v275_v9, %v65_v48 }
  0x88   :  { %v174_v25 = vpop.eup %173  ;;  %v165_v26 = vmul.f32 -1.442695, %v97_v24 }
  0x89   :  { %v104_v27 = vadd.f32 1.0, %v174_v25 }
  0x8a   :  { %175 = vpow2.f32 %v165_v26 }
  0x8b   :  { %177 = vrcp.f32 %v104_v27  ;;  %v117_v36 = vand.u32 2147483648, %v104_v27  ;;  %v115_v38 = vand.u32 2147483647, %v104_v27  ;;  %vm111_vm3 = vweird.f32 %v104_v27 }
  0x8d   :  { %v118_v42 = vor.u32 1.1754944e-38, %v117_v36  ;;  %vm116_vm5 = vcmp.eq.f32.partialorder %v115_v38, 8.507059e+37 }
  0x90   :  { %v176_v28 = vpop.eup %175 }
  0x91   :  { %v178_v30 = vpop.eup %177  ;;  %v105_v31 = vadd.f32 1.0, %v176_v28 }
  0x92   :  { %v107_v33 = vmul.f32 %v178_v30, %v104_v27  ;;  %vm112_vm2 = vweird.f32 %v178_v30 }
  0x93   :  { %179 = vrcp.f32 %v105_v31  ;;  %vm113_vm4 = vmor %vm111_vm3, %vm112_vm2  ;;  %v132_v50 = vand.u32 2147483648, %v105_v31  ;;  %v130_v53 = vand.u32 2147483647, %v105_v31  ;;  %vm126_vm7 = vweird.f32 %v105_v31 }
  0x94   :  { %v108_v35 = vsub.f32 1.0, %v107_v33 }
  0x95   :  { %v133_v56 = vor.u32 1.1754944e-38, %v132_v50  ;;  %vm131_vm9 = vcmp.eq.f32.partialorder %v130_v53, 8.507059e+37 }
  0x96   :  { %v109_v37 = vmul.f32 %v178_v30, %v108_v35 }
  0x98   :  { %v110_v39 = vadd.f32 %v178_v30, %v109_v37 }
  0x99   :  { %v180_v41 = vpop.eup %179 }
  0x9a   :  { %v114_v44 = vsel %vm113_vm4, %v178_v30, %v110_v39  ;;  %v122_v45 = vmul.f32 %v180_v41, %v105_v31  ;;  %vm127_vm6 = vweird.f32 %v180_v41 }
  0x9b   :  { %v119_v46 = vsel %vm116_vm5, %v118_v42, %v114_v44  ;;  %vm128_vm8 = vmor %vm126_vm7, %vm127_vm6 }
  0x9c   :  { %v138_v47 = vmul.f32 %v136_v40, %v119_v46  ;;  %v123_v49 = vsub.f32 1.0, %v122_v45 }
  0x9e   :  { %v140_v51 = vadd.f32 %v138_v47, %v62_v34  ;;  %v124_v52 = vmul.f32 %v180_v41, %v123_v49 }
  0xa0   :  { %142 = vst.msk [vmem:[#allocation3] sm:$0xff] %vm73_vm1, %v140_v51  ;;  %v125_v54 = vadd.f32 %v180_v41, %v124_v52 }
  0xa2   :  { %v129_v57 = vsel %vm128_vm8, %v180_v41, %v125_v54 }
  0xa3   :  { %v134_v58 = vsel %vm131_vm9, %v133_v56, %v129_v57 }
  0xa4   :  { %v139_v59 = vmul.f32 %v137_v55, %v134_v58 }
  0xa6   :  { %v141_v60 = vadd.f32 %v139_v59, %v65_v48 }
  0xa8   :  { %143 = vst.msk [vmem:[#allocation3 + $0x8] sm:$0xff] %vm73_vm1, %v141_v60 }
  0xa9   :  { %156 = dma.vmem_to_hbm [thread:$0]  %s149_s6, 256, %s151_s16, [#allocation4], %s208_s17, %s208_s17, %s209_s18  }
  0xaa   :  { %205 = dma.done.wait [#allocation4], 256  }
  0xab   :  { %206 = vsyncadd [#allocation4], 4294967040 }
  0xac   :  { %161 = vsyncpa [#allocation4], 1 }

</bundles_post_ra>
